<compile_context>
chip_gen: v7x
topology: tpu7x:2x2x1
jax: 0.10.0
libtpu: 0.0.40
codegen_flags: <defaults>
</compile_context>

<pallas_src>
import jax
import jax.numpy as jnp
from jax.experimental import pallas as pl
from jax.experimental.pallas import tpu as pltpu


def _round_up(x, m):
    return (x + m - 1) // m * m


def _critic_kernel(x_ref, w1_ref, b1_ref, w2_ref, b2_ref, w3_ref, b3_ref, o_ref):
    # One batch tile per grid step; weights stay resident across steps.
    x = x_ref[...]                                                        # [TB, S]
    h1 = jnp.dot(x, w1_ref[...], preferred_element_type=jnp.float32) + b1_ref[...]
    h1 = jnp.maximum(h1, 0.0)                                             # ReLU  [TB, H]
    h2 = jnp.dot(h1, w2_ref[...], preferred_element_type=jnp.float32) + b2_ref[...]
    h2 = jnp.maximum(h2, 0.0)                                             # ReLU  [TB, H]
    # Final 1-wide layer: elementwise mul + lane reduce (VPU/XLU) instead of an N=1 MXU pass.
    v = jnp.sum(h2 * w3_ref[...], axis=-1, keepdims=True) + b3_ref[...]   # [TB, 1]
    o_ref[...] = v.astype(o_ref.dtype)


def critic_forward(state, params, *, block_batch=1024):
    """state: [B, state_dim] f32 -> value: [B, 1] f32 (same math as the PyTorch module)."""
    w1, b1, w2, b2, w3, b3 = params
    B, S = state.shape
    H = w1.shape[1]

    # Pad hidden width to a multiple of 128 lanes (exactness preserved by zero padding).
    Hp = max(128, _round_up(H, 128))
    if Hp != H:
        w1 = jnp.pad(w1, ((0, 0), (0, Hp - H)))
        b1 = jnp.pad(b1, ((0, 0), (0, Hp - H)))
        w2 = jnp.pad(w2, ((0, Hp - H), (0, Hp - H)))
        b2 = jnp.pad(b2, ((0, 0), (0, Hp - H)))
        w3 = jnp.pad(w3, ((0, Hp - H), (0, 0)))
    w3_row = w3.reshape(1, Hp)  # transposed [1, Hp] row for the VPU reduce

    # Batch tile: multiple of 128 rows; pad B so the 1-D grid divides evenly.
    tb = min(block_batch, _round_up(B, 128))
    tb = max(128, _round_up(tb, 128))
    Bp = _round_up(B, tb)
    if Bp != B:
        state = jnp.pad(state, ((0, Bp - B), (0, 0)))
    n_tiles = Bp // tb

    const = lambda shape: pl.BlockSpec(shape, lambda i: (0, 0))  # VMEM-resident operand

    cost = pl.CostEstimate(
        flops=2 * Bp * (S * Hp + Hp * Hp + Hp),
        transcendentals=0,
        bytes_accessed=4 * (Bp * S + S * Hp + Hp * Hp + 3 * Hp + 1 + Bp),
    )

    out = pl.pallas_call(
        _critic_kernel,
        out_shape=jax.ShapeDtypeStruct((Bp, 1), jnp.float32),
        grid=(n_tiles,),
        in_specs=[
            pl.BlockSpec((tb, S), lambda i: (i, 0)),   # streamed / double-buffered state tile
            const((S, Hp)), const((1, Hp)),            # layer 1
            const((Hp, Hp)), const((1, Hp)),           # layer 2
            const((1, Hp)), const((1, 1)),             # layer 3 (row weight + bias)
        ],
        out_specs=pl.BlockSpec((tb, 1), lambda i: (i, 0)),
        compiler_params=pltpu.CompilerParams(
            dimension_semantics=("parallel",),         # shard batch tiles across TCs on v7x
        ),
        cost_estimate=cost,
    )(state, w1, b1, w2, b2, w3_row, b3)
    return out[:B]


def init_params(key, state_dim, hidden_size=64):
    """Deterministic init mimicking PyTorch nn.Linear defaults (U[-1/sqrt(fan_in), 1/sqrt(fan_in)])."""
    ks = jax.random.split(key, 6)

    def linear(kw, kb, fan_in, fan_out):
        bound = 1.0 / jnp.sqrt(jnp.float32(fan_in))
        w = jax.random.uniform(kw, (fan_in, fan_out), jnp.float32, -bound, bound)
        b = jax.random.uniform(kb, (1, fan_out), jnp.float32, -bound, bound)
        return w, b

    w1, b1 = linear(ks[0], ks[1], state_dim, hidden_size)
    w2, b2 = linear(ks[2], ks[3], hidden_size, hidden_size)
    w3, b3 = linear(ks[4], ks[5], hidden_size, 1)
    return (w1, b1, w2, b2, w3, b3)


def _ref_forward(s, p):
    w1, b1, w2, b2, w3, b3 = p
    h = jnp.maximum(s @ w1 + b1, 0.0)
    h = jnp.maximum(h @ w2 + b2, 0.0)
    return h @ w3 + b3


if __name__ == "__main__":
    key = jax.random.PRNGKey(0)
    k_params, k_state, k_state_big = jax.random.split(key, 3)

    batch, state_dim, hidden = 8, 16, 64
    params = init_params(k_params, state_dim, hidden)
    state = jax.random.normal(k_state, (batch, state_dim), jnp.float32)

    fwd = jax.jit(critic_forward, static_argnames=("block_batch",))

    # Small-batch correctness check (matches the PyTorch module semantics).
    value = fwd(state, params)
    jax.block_until_ready(value)
    ref = _ref_forward(state, params)
    assert value.shape == (batch, 1)
    assert jnp.allclose(value, ref, atol=1e-5, rtol=1e-5)

    # Larger, non-aligned batch exercising the multi-tile grid + padding path.
    big_b = 1000
    state_big = jax.random.normal(k_state_big, (big_b, state_dim), jnp.float32)
    value_big = fwd(state_big, params, block_batch=256)
    jax.block_until_ready(value_big)
    ref_big = _ref_forward(state_big, params)
    assert value_big.shape == (big_b, 1)
    assert jnp.allclose(value_big, ref_big, atol=1e-4, rtol=1e-4)

    print("KERNEL_OK")
</pallas_src>

<mosaic_0001>
module attributes {stable_mosaic.version = 11 : i64} {
  func.func @_critic_kernel(%arg0: i32, %arg1: memref<128x16xf32, #tpu.memory_space<vmem>>, %arg2: memref<16x128xf32, #tpu.memory_space<vmem>>, %arg3: memref<1x128xf32, #tpu.memory_space<vmem>>, %arg4: memref<128x128xf32, #tpu.memory_space<vmem>>, %arg5: memref<1x128xf32, #tpu.memory_space<vmem>>, %arg6: memref<1x128xf32, #tpu.memory_space<vmem>>, %arg7: memref<1x1xf32, #tpu.memory_space<vmem>>, %arg8: memref<128x1xf32, #tpu.memory_space<vmem>>) attributes {dimension_semantics = [#tpu.dimension_semantics<parallel>], iteration_bounds = array<i64: 1>, scalar_prefetch = 0 : i64, scratch_operands = 0 : i64, tpu.core_type = #tpu.core_type<tc>, window_params = [{transform_indices = @transform_0, window_bounds = array<i64: 128, 16>}, {pipeline_mode = #tpu.pipeline_mode<synchronous>, transform_indices = @transform_1, window_bounds = array<i64: 16, 128>}, {pipeline_mode = #tpu.pipeline_mode<synchronous>, transform_indices = @transform_2, window_bounds = array<i64: 1, 128>}, {pipeline_mode = #tpu.pipeline_mode<synchronous>, transform_indices = @transform_3, window_bounds = array<i64: 128, 128>}, {pipeline_mode = #tpu.pipeline_mode<synchronous>, transform_indices = @transform_4, window_bounds = array<i64: 1, 128>}, {pipeline_mode = #tpu.pipeline_mode<synchronous>, transform_indices = @transform_5, window_bounds = array<i64: 1, 128>}, {pipeline_mode = #tpu.pipeline_mode<synchronous>, transform_indices = @transform_6, window_bounds = array<i64: 1, 1>}, {transform_indices = @transform_7, window_bounds = array<i64: 128, 1>}]} {
    %c0 = arith.constant 0 : index
    %c0_0 = arith.constant 0 : index
    %0 = vector.load %arg1[%c0, %c0_0] : memref<128x16xf32, #tpu.memory_space<vmem>>, vector<128x16xf32>
    %c0_1 = arith.constant 0 : index
    %c0_2 = arith.constant 0 : index
    %1 = vector.load %arg2[%c0_1, %c0_2] : memref<16x128xf32, #tpu.memory_space<vmem>>, vector<16x128xf32>
    %cst = arith.constant dense<0.000000e+00> : vector<128x128xf32>
    %2 = tpu.matmul %0, %1, %cst {dimension_numbers = #tpu.dot_dimension_numbers<[1], [0], [0], [1], [0, 0, 1, 1], [], []>} : vector<128x16xf32>, vector<16x128xf32>, vector<128x128xf32> -> vector<128x128xf32>
    %c0_3 = arith.constant 0 : index
    %c0_4 = arith.constant 0 : index
    %3 = vector.load %arg3[%c0_3, %c0_4] : memref<1x128xf32, #tpu.memory_space<vmem>>, vector<1x128xf32>
    %4 = vector.broadcast %3 : vector<1x128xf32> to vector<128x128xf32>
    %5 = arith.addf %2, %4 : vector<128x128xf32>
    %cst_5 = arith.constant 0.000000e+00 : f32
    %6 = vector.broadcast %cst_5 : f32 to vector<128x128xf32>
    %7 = arith.maximumf %5, %6 : vector<128x128xf32>
    %c0_6 = arith.constant 0 : index
    %c0_7 = arith.constant 0 : index
    %8 = vector.load %arg4[%c0_6, %c0_7] : memref<128x128xf32, #tpu.memory_space<vmem>>, vector<128x128xf32>
    %cst_8 = arith.constant dense<0.000000e+00> : vector<128x128xf32>
    %9 = tpu.matmul %7, %8, %cst_8 {dimension_numbers = #tpu.dot_dimension_numbers<[1], [0], [0], [1], [0, 0, 1, 1], [], []>} : vector<128x128xf32>, vector<128x128xf32>, vector<128x128xf32> -> vector<128x128xf32>
    %c0_9 = arith.constant 0 : index
    %c0_10 = arith.constant 0 : index
    %10 = vector.load %arg5[%c0_9, %c0_10] : memref<1x128xf32, #tpu.memory_space<vmem>>, vector<1x128xf32>
    %11 = vector.broadcast %10 : vector<1x128xf32> to vector<128x128xf32>
    %12 = arith.addf %9, %11 : vector<128x128xf32>
    %cst_11 = arith.constant 0.000000e+00 : f32
    %13 = vector.broadcast %cst_11 : f32 to vector<128x128xf32>
    %14 = arith.maximumf %12, %13 : vector<128x128xf32>
    %c0_12 = arith.constant 0 : index
    %c0_13 = arith.constant 0 : index
    %15 = vector.load %arg6[%c0_12, %c0_13] : memref<1x128xf32, #tpu.memory_space<vmem>>, vector<1x128xf32>
    %16 = vector.broadcast %15 : vector<1x128xf32> to vector<128x128xf32>
    %17 = arith.mulf %14, %16 : vector<128x128xf32>
    %cst_14 = arith.constant dense<0.000000e+00> : vector<128xf32>
    %18 = vector.multi_reduction <add>, %17, %cst_14 [1] : vector<128x128xf32> to vector<128xf32>
    %19 = vector.shape_cast %18 : vector<128xf32> to vector<128x1xf32>
    %c0_15 = arith.constant 0 : index
    %c0_16 = arith.constant 0 : index
    %20 = vector.load %arg7[%c0_15, %c0_16] : memref<1x1xf32, #tpu.memory_space<vmem>>, vector<1x1xf32>
    %21 = vector.broadcast %20 : vector<1x1xf32> to vector<128x1xf32>
    %22 = arith.addf %19, %21 : vector<128x1xf32>
    %c0_17 = arith.constant 0 : index
    %c0_18 = arith.constant 0 : index
    %23 = vector.load %arg8[%c0_17, %c0_18] : memref<128x1xf32, #tpu.memory_space<vmem>>, vector<128x1xf32>
    tpu.vector_store %arg8[%c0_17, %c0_18], %22 {strides = array<i32>} : memref<128x1xf32, #tpu.memory_space<vmem>>, vector<128x1xf32>,
    return
  }
  func.func @transform_0(%arg0: i32) -> (i32, i32) {
    %c0_i32 = arith.constant 0 : i32
    %c0_i32_0 = arith.constant 0 : i32
    return %arg0, %c0_i32 : i32, i32
  }
  func.func @transform_1(%arg0: i32) -> (i32, i32) {
    %c0_i32 = arith.constant 0 : i32
    %c0_i32_0 = arith.constant 0 : i32
    %c0_i32_1 = arith.constant 0 : i32
    return %c0_i32, %c0_i32_0 : i32, i32
  }
  func.func @transform_2(%arg0: i32) -> (i32, i32) {
    %c0_i32 = arith.constant 0 : i32
    %c0_i32_0 = arith.constant 0 : i32
    %c0_i32_1 = arith.constant 0 : i32
    return %c0_i32, %c0_i32_0 : i32, i32
  }
  func.func @transform_3(%arg0: i32) -> (i32, i32) {
    %c0_i32 = arith.constant 0 : i32
    %c0_i32_0 = arith.constant 0 : i32
    %c0_i32_1 = arith.constant 0 : i32
    return %c0_i32, %c0_i32_0 : i32, i32
  }
  func.func @transform_4(%arg0: i32) -> (i32, i32) {
    %c0_i32 = arith.constant 0 : i32
    %c0_i32_0 = arith.constant 0 : i32
    %c0_i32_1 = arith.constant 0 : i32
    return %c0_i32, %c0_i32_0 : i32, i32
  }
  func.func @transform_5(%arg0: i32) -> (i32, i32) {
    %c0_i32 = arith.constant 0 : i32
    %c0_i32_0 = arith.constant 0 : i32
    %c0_i32_1 = arith.constant 0 : i32
    return %c0_i32, %c0_i32_0 : i32, i32
  }
  func.func @transform_6(%arg0: i32) -> (i32, i32) {
    %c0_i32 = arith.constant 0 : i32
    %c0_i32_0 = arith.constant 0 : i32
    %c0_i32_1 = arith.constant 0 : i32
    return %c0_i32, %c0_i32_0 : i32, i32
  }
  func.func @transform_7(%arg0: i32) -> (i32, i32) {
    %c0_i32 = arith.constant 0 : i32
    %c0_i32_0 = arith.constant 0 : i32
    return %arg0, %c0_i32 : i32, i32
  }
}

</mosaic_0001>

<bundles_post_ra>
// kernel: critic_forward.1
= control target key start
LH: loop header
LB: loop body
LE: loop exit
PB: predicated region body
PF: predicated region fallthrough
CT: control target
= control target key end

     0   :  { %vm53_vm0 = vcmask 130048   ;;  %vm525_vm1 = vcmask 7168   ;;  %s1022_s1 = inlined_call_operand.vmem [shape: f32[16,128], index: 1, kind: input, shape index: {}]   ;;  %s1023_s0 = inlined_call_operand.vmem [shape: f32[128,16], index: 0, kind: input, shape index: {}]   ;;  %s1024_s3 = inlined_call_operand.vmem [shape: f32[128,128], index: 3, kind: input, shape index: {}]   ;;  %s1025_s2 = inlined_call_operand.vmem [shape: f32[1,128], index: 2, kind: input, shape index: {}]   ;;  %s1026_s6 = inlined_call_operand.<no memory space> [shape: f32[1,1], index: 6, kind: input, shape index: {}]   ;;  %s1027_s4 = inlined_call_operand.vmem [shape: f32[1,128], index: 4, kind: input, shape index: {}]   ;;  %s1028_s5 = inlined_call_operand.vmem [shape: f32[1,128], index: 5, kind: input, shape index: {}]   ;;  %s1029_s7 = inlined_call_operand.vmem [shape: f32[128,1], index: 7, kind: output, shape index: {}]  }
   0x1   :  { %v44_v0 = vld [vmem:[%s1022_s1] sm:$0xff]  ;;  %v45_v1 = vld [vmem:[%s1022_s1 + $0x8] sm:$0xff]  ;;  %v30_v5 = vld [vmem:[%s1023_s0 + $0x10] sm:$0xff] }
   0x2   :  { %v28_v2 = vld [vmem:[%s1023_s0] sm:$0xff]  ;;  %v700_v3 = vpack.c.bf16 %v45_v1, %v44_v0  ;;  %v29_v4 = vld [vmem:[%s1023_s0 + $0x8] sm:$0xff]  ;;  %v265_v8 = vld [vmem:[%s1024_s3 + $0x10] sm:$0xff] }
   0x3   :  { %620 = vmatprep.mubr.msk.f32.mxu0 %vm53_vm0, %v28_v2  ;;  %v263_v6 = vld [vmem:[%s1024_s3] sm:$0xff]  ;;  %v264_v7 = vld [vmem:[%s1024_s3 + $0x8] sm:$0xff]  ;;  %v266_v10 = vld [vmem:[%s1024_s3 + $0x18] sm:$0xff] }
   0x4   :  { %701 = vmatprep.subr.bf16.mxu0 %v700_v3  ;;  %v704_v9 = vpack.c.bf16 %v264_v7, %v263_v6  ;;  %v31_v11 = vld [vmem:[%s1023_s0 + $0x18] sm:$0xff]  ;;  %v708_v12 = vpack.c.bf16 %v266_v10, %v265_v8  ;;  %v267_v13 = vld [vmem:[%s1024_s3 + $0x20] sm:$0xff]  ;;  %v268_v14 = vld [vmem:[%s1024_s3 + $0x28] sm:$0xff] }
   0x5   :  { %703 = vmatpush3.bf16.msra.mxu0 %v700_v3  ;;  %v32_v15 = vld [vmem:[%s1023_s0 + $0x20] sm:$0xff]  ;;  %v712_v16 = vpack.c.bf16 %v268_v14, %v267_v13  ;;  %v33_v17 = vld [vmem:[%s1023_s0 + $0x28] sm:$0xff]  ;;  %v269_v18 = vld [vmem:[%s1024_s3 + $0x30] sm:$0xff] }
   0x6   :  { %705 = vmatprep.subr.bf16.mxu0 %v704_v9  ;;  %736 = vmatprep.subr.bf16.mxu1 %v704_v9  ;;  %v270_v19 = vld [vmem:[%s1024_s3 + $0x38] sm:$0xff]  ;;  %v34_v20 = vld [vmem:[%s1023_s0 + $0x30] sm:$0xff]  ;;  %v271_v23 = vld [vmem:[%s1024_s3 + $0x40] sm:$0xff] }
   0x7   :  { %744 = vmatpush3.bf16.msra.mxu1 %v704_v9  ;;  %v716_v21 = vpack.c.bf16 %v270_v19, %v269_v18  ;;  %v35_v22 = vld [vmem:[%s1023_s0 + $0x38] sm:$0xff]  ;;  %v272_v24 = vld [vmem:[%s1024_s3 + $0x48] sm:$0xff]  ;;  %v36_v25 = vld [vmem:[%s1023_s0 + $0x40] sm:$0xff] }
   0x8   :  { %621 = vmatmul.mubr.msk.f32.vlgmr.msra.gmra.mrb[0].mxu0 %vm53_vm0, %v29_v4  ;;  %737 = vmatprep.subr.bf16.mxu1 %v708_v12  ;;  %v720_v26 = vpack.c.bf16 %v272_v24, %v271_v23  ;;  %v37_v27 = vld [vmem:[%s1023_s0 + $0x48] sm:$0xff]  ;;  %v273_v28 = vld [vmem:[%s1024_s3 + $0x50] sm:$0xff]  ;;  %v274_v29 = vld [vmem:[%s1024_s3 + $0x58] sm:$0xff] }
   0x9   :  { %623 = vmatprep.mubr.msk.f32.mxu0 %vm53_vm0, %v30_v5  ;;  %707 = vmatpush3.bf16.msra.mxu0 %v704_v9  ;;  %v38_v30 = vld [vmem:[%s1023_s0 + $0x50] sm:$0xff]  ;;  %v724_v31 = vpack.c.bf16 %v274_v29, %v273_v28  ;;  %v39_v32 = vld [vmem:[%s1023_s0 + $0x58] sm:$0xff]  ;;  %v275_v33 = vld [vmem:[%s1024_s3 + $0x60] sm:$0xff]  ;;  %v12_v28 = vstv %s1026_s6 }
   0xa   :  { %709 = vmatprep.subr.bf16.mxu0 %v708_v12  ;;  %v276_v34 = vld [vmem:[%s1024_s3 + $0x68] sm:$0xff]  ;;  %v40_v35 = vld [vmem:[%s1023_s0 + $0x60] sm:$0xff]  ;;  %v42_v38 = vld [vmem:[%s1023_s0 + $0x70] sm:$0xff]  ;;  %13 = vst [vmem:[#allocation2] sm:$0x1] %v12_v28 }
   0xb   :  { %745 = vmatpush3.bf16.msra.mxu1 %v708_v12  ;;  %v728_v36 = vpack.c.bf16 %v276_v34, %v275_v33  ;;  %v41_v37 = vld [vmem:[%s1023_s0 + $0x68] sm:$0xff]  ;;  %v43_v39 = vld [vmem:[%s1023_s0 + $0x78] sm:$0xff]  ;;  %v277_v40 = vld [vmem:[%s1024_s3 + $0x70] sm:$0xff] }
   0xc   :  { %624 = vmatmul.mubr.msk.f32.gmra.mrb[2].mxu0 %vm53_vm0, %v31_v11  ;;  %738 = vmatprep.subr.bf16.mxu1 %v712_v16  ;;  %v278_v41 = vld [vmem:[%s1024_s3 + $0x78] sm:$0xff]  ;;  %v546_v43 = vld [vmem:[%s1025_s2] ss:$0 sm:$0xff] }
   0xd   :  { %626 = vmatprep.mubr.msk.f32.mxu0 %vm53_vm0, %v32_v15  ;;  %711 = vmatpush3.bf16.msra.mxu0 %v708_v12  ;;  %v732_v42 = vpack.c.bf16 %v278_v41, %v277_v40  ;;  %v919_v29 = vld [vmem:[%s1027_s4] ss:$0 sm:$0xff] }
   0xe   :  { %713 = vmatprep.subr.bf16.mxu0 %v712_v16  ;;  %v926_v34 = vld [vmem:[%s1028_s5] ss:$0 sm:$0xff] }
   0xf   :  { %746 = vmatpush3.bf16.msra.mxu1 %v712_v16 }
  0x10   :  { %627 = vmatmul.mubr.msk.f32.gmra.mrb[4].mxu0 %vm53_vm0, %v33_v17  ;;  %739 = vmatprep.subr.bf16.mxu1 %v716_v21 }
  0x11   :  { %629 = vmatprep.mubr.msk.f32.mxu0 %vm53_vm0, %v34_v20  ;;  %715 = vmatpush3.bf16.msra.mxu0 %v712_v16 }
  0x12   :  { %717 = vmatprep.subr.bf16.mxu0 %v716_v21 }
  0x13   :  { %747 = vmatpush3.bf16.msra.mxu1 %v716_v21 }
  0x14   :  { %630 = vmatmul.mubr.msk.f32.gmra.mrb[6].mxu0 %vm53_vm0, %v35_v22  ;;  %740 = vmatprep.subr.bf16.mxu1 %v720_v26 }
  0x15   :  { %632 = vmatprep.mubr.msk.f32.mxu0 %vm53_vm0, %v36_v25  ;;  %719 = vmatpush3.bf16.msra.mxu0 %v716_v21 }
  0x16   :  { %721 = vmatprep.subr.bf16.mxu0 %v720_v26 }
  0x17   :  { %748 = vmatpush3.bf16.msra.mxu1 %v720_v26 }
  0x18   :  { %633 = vmatmul.mubr.msk.f32.gmra.mrb[8].mxu0 %vm53_vm0, %v37_v27  ;;  %741 = vmatprep.subr.bf16.mxu1 %v724_v31 }
  0x19   :  { %635 = vmatprep.mubr.msk.f32.mxu0 %vm53_vm0, %v38_v30  ;;  %723 = vmatpush3.bf16.msra.mxu0 %v720_v26 }
  0x1a   :  { %725 = vmatprep.subr.bf16.mxu0 %v724_v31 }
  0x1b   :  { %749 = vmatpush3.bf16.msra.mxu1 %v724_v31 }
  0x1c   :  { %636 = vmatmul.mubr.msk.f32.gmra.mrb[10].mxu0 %vm53_vm0, %v39_v32  ;;  %742 = vmatprep.subr.bf16.mxu1 %v728_v36 }
  0x1d   :  { %638 = vmatprep.mubr.msk.f32.mxu0 %vm53_vm0, %v40_v35  ;;  %727 = vmatpush3.bf16.msra.mxu0 %v724_v31 }
  0x1e   :  { %729 = vmatprep.subr.bf16.mxu0 %v728_v36 }
  0x1f   :  { %750 = vmatpush3.bf16.msra.mxu1 %v728_v36 }
  0x20   :  { %639 = vmatmul.mubr.msk.f32.gmra.mrb[12].mxu0 %vm53_vm0, %v41_v37  ;;  %743 = vmatprep.subr.bf16.mxu1 %v732_v42 }
  0x21   :  { %641 = vmatprep.mubr.msk.f32.mxu0 %vm53_vm0, %v42_v38  ;;  %731 = vmatpush3.bf16.msra.mxu0 %v728_v36 }
  0x22   :  { %733 = vmatprep.subr.bf16.mxu0 %v732_v42 }
  0x23   :  { %751 = vmatpush3.bf16.msra.mxu1 %v732_v42 }
  0x24   :  { %642 = vmatmul.mubr.msk.f32.gmra.mrb[14].mxu0 %vm53_vm0, %v43_v39 }
  0x25   :  { %735 = vmatpush3.bf16.msra.mxu0 %v732_v42 }
  0xdb   :  { %v622_v44 = vpop.f32.mrb[0].mxu0 }
  0xdc   :  { %v174_v45 = vadd.f32 %v622_v44, %v546_v43  ;;  %v168_v46 = vpop.f32.mrb[1].mxu0 }
  0xdd   :  { %v169_v47 = vadd.f32 %v546_v43, %v168_v46 }
  0xde   :  { %v248_v50 = vmax.f32 %v174_v45, 0.0 }
  0xdf   :  { %v247_v48 = vmax.f32 %v169_v47, 0.0  ;;  %v625_v49 = vpop.f32.mrb[2].mxu0 }
  0xe0   :  { %v184_v51 = vadd.f32 %v625_v49, %v546_v43  ;;  %v178_v52 = vpop.f32.mrb[3].mxu0 }
  0xe1   :  { %v179_v53 = vadd.f32 %v546_v43, %v178_v52  ;;  %676 = vmatprep.mubr.f32.mxu0 %v247_v48 }
  0xe2   :  { %677 = vmatmul.mubr.f32.vlgmr.msra.gmra.mrb[16].mxu0 %v248_v50  ;;  %v250_v56 = vmax.f32 %v184_v51, 0.0 }
  0xe3   :  { %v249_v54 = vmax.f32 %v179_v53, 0.0  ;;  %v628_v55 = vpop.f32.mrb[4].mxu0 }
  0xe4   :  { %v194_v57 = vadd.f32 %v628_v55, %v546_v43  ;;  %v188_v58 = vpop.f32.mrb[5].mxu0 }
  0xe5   :  { %v189_v59 = vadd.f32 %v546_v43, %v188_v58  ;;  %679 = vmatprep.mubr.f32.mxu0 %v249_v54 }
  0xe6   :  { %v252_v60 = vmax.f32 %v194_v57, 0.0  ;;  %680 = vmatmul.mubr.f32.gmra.mrb[18].mxu0 %v250_v56 }
  0xe7   :  { %v251_v61 = vmax.f32 %v189_v59, 0.0  ;;  %v631_v62 = vpop.f32.mrb[6].mxu0 }
  0xe8   :  { %v204_v63 = vadd.f32 %v631_v62, %v546_v43  ;;  %v198_v0 = vpop.f32.mrb[7].mxu0 }
  0xe9   :  { %682 = vmatprep.mubr.f32.mxu0 %v251_v61  ;;  %v199_v1 = vadd.f32 %v546_v43, %v198_v0 }
  0xea   :  { %v254_v2 = vmax.f32 %v204_v63, 0.0  ;;  %683 = vmatmul.mubr.f32.gmra.mrb[20].mxu0 %v252_v60 }
  0xeb   :  { %v634_v3 = vpop.f32.mrb[8].mxu0  ;;  %v253_v4 = vmax.f32 %v199_v1, 0.0 }
  0xec   :  { %v214_v5 = vadd.f32 %v634_v3, %v546_v43  ;;  %v208_v6 = vpop.f32.mrb[9].mxu0 }
  0xed   :  { %v209_v7 = vadd.f32 %v546_v43, %v208_v6  ;;  %685 = vmatprep.mubr.f32.mxu1 %v253_v4 }
  0xee   :  { %v256_v8 = vmax.f32 %v214_v5, 0.0  ;;  %686 = vmatmul.mubr.f32.vlgmr.msra.gmra.mrb[0].mxu1 %v254_v2 }
  0xef   :  { %v255_v9 = vmax.f32 %v209_v7, 0.0  ;;  %v637_v10 = vpop.f32.mrb[10].mxu0 }
  0xf0   :  { %v224_v11 = vadd.f32 %v637_v10, %v546_v43  ;;  %v218_v12 = vpop.f32.mrb[11].mxu0 }
  0xf1   :  { %v219_v13 = vadd.f32 %v546_v43, %v218_v12  ;;  %688 = vmatprep.mubr.f32.mxu1 %v255_v9 }
  0xf2   :  { %v258_v14 = vmax.f32 %v224_v11, 0.0  ;;  %689 = vmatmul.mubr.f32.gmra.mrb[2].mxu1 %v256_v8 }
  0xf3   :  { %v257_v15 = vmax.f32 %v219_v13, 0.0  ;;  %v640_v16 = vpop.f32.mrb[12].mxu0 }
  0xf4   :  { %v234_v17 = vadd.f32 %v640_v16, %v546_v43  ;;  %v228_v18 = vpop.f32.mrb[13].mxu0 }
  0xf5   :  { %v229_v19 = vadd.f32 %v546_v43, %v228_v18  ;;  %691 = vmatprep.mubr.f32.mxu1 %v257_v15 }
  0xf6   :  { %v260_v20 = vmax.f32 %v234_v17, 0.0  ;;  %692 = vmatmul.mubr.f32.gmra.mrb[4].mxu1 %v258_v14 }
  0xf7   :  { %v259_v21 = vmax.f32 %v229_v19, 0.0  ;;  %v643_v22 = vpop.f32.mrb[14].mxu0 }
  0xf8   :  { %v244_v23 = vadd.f32 %v643_v22, %v546_v43  ;;  %v238_v24 = vpop.f32.mrb[15].mxu0 }
  0xf9   :  { %v239_v25 = vadd.f32 %v546_v43, %v238_v24  ;;  %694 = vmatprep.mubr.f32.mxu1 %v259_v21 }
  0xfa   :  { %v262_v26 = vmax.f32 %v244_v23, 0.0  ;;  %695 = vmatmul.mubr.f32.gmra.mrb[6].mxu1 %v260_v20 }
  0xfb   :  { %v261_v27 = vmax.f32 %v239_v25, 0.0 }
  0xfd   :  { %697 = vmatprep.mubr.f32.mxu1 %v261_v27 }
  0xfe   :  { %698 = vmatmul.mubr.f32.gmra.mrb[8].mxu1 %v262_v26 }
 0x1b5   :  { %v678_v30 = vpop.f32.mrb[16].mxu0 }
 0x1b6   :  { %v358_v31 = vadd.f32 %v678_v30, %v919_v29  ;;  %v352_v32 = vpop.f32.mrb[17].mxu0 }
 0x1b7   :  { %v353_v33 = vadd.f32 %v919_v29, %v352_v32  ;;  %v565_v32 = vld [vmem:[#allocation2] ss:$0 sm:$0xff] }
 0x1b8   :  { %v432_v35 = vmax.f32 %v358_v31, 0.0 }
 0x1b9   :  { %v681_v36 = vpop.f32.mrb[18].mxu0  ;;  %v431_v37 = vmax.f32 %v353_v33, 0.0 }
 0x1ba   :  { %v368_v38 = vadd.f32 %v681_v36, %v919_v29  ;;  %v362_v39 = vpop.f32.mrb[19].mxu0  ;;  %v455_v40 = vmul.f32 %v926_v34, %v432_v35 }
 0x1bb   :  { %v363_v41 = vadd.f32 %v919_v29, %v362_v39  ;;  %v454_v48 = vmul.f32 %v926_v34, %v431_v37 }
 0x1bc   :  { %v434_v42 = vmax.f32 %v368_v38, 0.0  ;;  %472 = vadd.xlane.f32.xlu0 %v455_v40 }
 0x1bd   :  { %v684_v43 = vpop.f32.mrb[20].mxu0  ;;  %v433_v44 = vmax.f32 %v363_v41, 0.0 }
 0x1be   :  { %v378_v45 = vadd.f32 %v684_v43, %v919_v29  ;;  %v372_v46 = vpop.f32.mrb[21].mxu0  ;;  %v457_v47 = vmul.f32 %v926_v34, %v434_v42 }
 0x1bf   :  { %v373_v49 = vadd.f32 %v919_v29, %v372_v46  ;;  %v456_v55 = vmul.f32 %v926_v34, %v433_v44 }
 0x1c0   :  { %476 = vadd.xlane.f32.xlu1 %v457_v47  ;;  %470 = vadd.xlane.f32.xlu0 %v454_v48  ;;  %v436_v52 = vmax.f32 %v378_v45, 0.0 }
 0x1c1   :  { %v435_v50 = vmax.f32 %v373_v49, 0.0  ;;  %v687_v51 = vpop.f32.mrb[0].mxu1 }
 0x1c2   :  { %v388_v53 = vadd.f32 %v687_v51, %v919_v29  ;;  %v382_v54 = vpop.f32.mrb[1].mxu1  ;;  %v459_v63 = vmul.f32 %v926_v34, %v436_v52 }
 0x1c3   :  { %v383_v56 = vadd.f32 %v919_v29, %v382_v54  ;;  %v458_v57 = vmul.f32 %v926_v34, %v435_v50 }
 0x1c4   :  { %474 = vadd.xlane.f32.xlu1 %v456_v55  ;;  %v438_v60 = vmax.f32 %v388_v53, 0.0 }
 0x1c5   :  { %v437_v58 = vmax.f32 %v383_v56, 0.0  ;;  %v690_v59 = vpop.f32.mrb[2].mxu1  ;;  %478 = vadd.xlane.f32.xlu0 %v458_v57 }
 0x1c6   :  { %v398_v61 = vadd.f32 %v690_v59, %v919_v29  ;;  %v392_v62 = vpop.f32.mrb[3].mxu1  ;;  %v461_v7 = vmul.f32 %v926_v34, %v438_v60 }
 0x1c7   :  { %v393_v0 = vadd.f32 %v919_v29, %v392_v62  ;;  %v460_v1 = vmul.f32 %v926_v34, %v437_v58 }
 0x1c8   :  { %480 = vadd.xlane.f32.xlu1 %v459_v63  ;;  %v440_v4 = vmax.f32 %v398_v61, 0.0 }
 0x1c9   :  { %v439_v2 = vmax.f32 %v393_v0, 0.0  ;;  %v693_v3 = vpop.f32.mrb[4].mxu1  ;;  %482 = vadd.xlane.f32.xlu0 %v460_v1 }
 0x1ca   :  { %v408_v5 = vadd.f32 %v693_v3, %v919_v29  ;;  %v402_v6 = vpop.f32.mrb[5].mxu1  ;;  %v463_v15 = vmul.f32 %v926_v34, %v440_v4 }
 0x1cb   :  { %v403_v8 = vadd.f32 %v919_v29, %v402_v6  ;;  %v462_v9 = vmul.f32 %v926_v34, %v439_v2 }
 0x1cc   :  { %484 = vadd.xlane.f32.xlu1 %v461_v7  ;;  %v442_v12 = vmax.f32 %v408_v5, 0.0 }
 0x1cd   :  { %v441_v10 = vmax.f32 %v403_v8, 0.0  ;;  %v696_v11 = vpop.f32.mrb[6].mxu1  ;;  %486 = vadd.xlane.f32.xlu0 %v462_v9 }
 0x1ce   :  { %v418_v13 = vadd.f32 %v696_v11, %v919_v29  ;;  %v412_v14 = vpop.f32.mrb[7].mxu1  ;;  %v465_v23 = vmul.f32 %v926_v34, %v442_v12 }
 0x1cf   :  { %v413_v16 = vadd.f32 %v919_v29, %v412_v14  ;;  %v464_v17 = vmul.f32 %v926_v34, %v441_v10 }
 0x1d0   :  { %488 = vadd.xlane.f32.xlu1 %v463_v15  ;;  %v444_v20 = vmax.f32 %v418_v13, 0.0 }
 0x1d1   :  { %v443_v18 = vmax.f32 %v413_v16, 0.0  ;;  %v699_v19 = vpop.f32.mrb[8].mxu1  ;;  %490 = vadd.xlane.f32.xlu0 %v464_v17 }
 0x1d2   :  { %v428_v21 = vadd.f32 %v699_v19, %v919_v29  ;;  %v422_v22 = vpop.f32.mrb[9].mxu1  ;;  %v467_v28 = vmul.f32 %v926_v34, %v444_v20 }
 0x1d3   :  { %v423_v24 = vadd.f32 %v919_v29, %v422_v22  ;;  %v466_v25 = vmul.f32 %v926_v34, %v443_v18 }
 0x1d4   :  { %492 = vadd.xlane.f32.xlu1 %v465_v23  ;;  %v446_v27 = vmax.f32 %v428_v21, 0.0 }
 0x1d5   :  { %v445_v26 = vmax.f32 %v423_v24, 0.0  ;;  %494 = vadd.xlane.f32.xlu0 %v466_v25 }
 0x1d6   :  { %v469_v31 = vmul.f32 %v926_v34, %v446_v27 }
 0x1d7   :  { %v468_v30 = vmul.f32 %v926_v34, %v445_v26 }
 0x1d8   :  { %496 = vadd.xlane.f32.xlu1 %v467_v28 }
 0x1d9   :  { %498 = vadd.xlane.f32.xlu0 %v468_v30 }
 0x1dc   :  { %500 = vadd.xlane.f32.xlu1 %v469_v31 }
 0x249   :  { %v473_v33 = vpop.xlane.xlu0 %472 }
 0x24a   :  { %v510_v35 = vadd.f32 %v565_v32, %v473_v33 }
 0x24c   :  { %527 = vst.msk [vmem:[%s1029_s7 + $0x8] sm:$0xff] %vm525_vm1, %v510_v35 }
 0x24d   :  { %v477_v29 = vpop.xlane.xlu1 %476  ;;  %v471_v36 = vpop.xlane.xlu0 %470 }
 0x24e   :  { %v512_v37 = vadd.f32 %v565_v32, %v477_v29  ;;  %v509_v38 = vadd.f32 %v565_v32, %v471_v36 }
 0x250   :  { %529 = vst.msk [vmem:[%s1029_s7 + $0x18] sm:$0xff] %vm525_vm1, %v512_v37  ;;  %526 = vst.msk [vmem:[%s1029_s7] sm:$0xff] %vm525_vm1, %v509_v38 }
 0x251   :  { %v475_v34 = vpop.xlane.xlu1 %474 }
 0x252   :  { %v511_v39 = vadd.f32 %v565_v32, %v475_v34  ;;  %v479_v40 = vpop.xlane.xlu0 %478 }
 0x253   :  { %v513_v41 = vadd.f32 %v565_v32, %v479_v40 }
 0x254   :  { %528 = vst.msk [vmem:[%s1029_s7 + $0x10] sm:$0xff] %vm525_vm1, %v511_v39 }
 0x255   :  { %530 = vst.msk [vmem:[%s1029_s7 + $0x20] sm:$0xff] %vm525_vm1, %v513_v41  ;;  %v481_v42 = vpop.xlane.xlu1 %480 }
 0x256   :  { %v514_v43 = vadd.f32 %v565_v32, %v481_v42  ;;  %v483_v44 = vpop.xlane.xlu0 %482 }
 0x257   :  { %v515_v45 = vadd.f32 %v565_v32, %v483_v44 }
 0x258   :  { %531 = vst.msk [vmem:[%s1029_s7 + $0x28] sm:$0xff] %vm525_vm1, %v514_v43 }
 0x259   :  { %532 = vst.msk [vmem:[%s1029_s7 + $0x30] sm:$0xff] %vm525_vm1, %v515_v45  ;;  %v485_v46 = vpop.xlane.xlu1 %484 }
 0x25a   :  { %v516_v47 = vadd.f32 %v565_v32, %v485_v46  ;;  %v487_v48 = vpop.xlane.xlu0 %486 }
 0x25b   :  { %v517_v49 = vadd.f32 %v565_v32, %v487_v48 }
 0x25c   :  { %533 = vst.msk [vmem:[%s1029_s7 + $0x38] sm:$0xff] %vm525_vm1, %v516_v47 }
 0x25d   :  { %534 = vst.msk [vmem:[%s1029_s7 + $0x40] sm:$0xff] %vm525_vm1, %v517_v49  ;;  %v489_v50 = vpop.xlane.xlu1 %488 }
 0x25e   :  { %v518_v51 = vadd.f32 %v565_v32, %v489_v50  ;;  %v491_v52 = vpop.xlane.xlu0 %490 }
 0x25f   :  { %v519_v53 = vadd.f32 %v565_v32, %v491_v52 }
 0x260   :  { %535 = vst.msk [vmem:[%s1029_s7 + $0x48] sm:$0xff] %vm525_vm1, %v518_v51 }
 0x261   :  { %536 = vst.msk [vmem:[%s1029_s7 + $0x50] sm:$0xff] %vm525_vm1, %v519_v53  ;;  %v493_v54 = vpop.xlane.xlu1 %492 }
 0x262   :  { %v520_v55 = vadd.f32 %v565_v32, %v493_v54  ;;  %v495_v56 = vpop.xlane.xlu0 %494 }
 0x263   :  { %v521_v57 = vadd.f32 %v565_v32, %v495_v56 }
 0x264   :  { %537 = vst.msk [vmem:[%s1029_s7 + $0x58] sm:$0xff] %vm525_vm1, %v520_v55 }
 0x265   :  { %538 = vst.msk [vmem:[%s1029_s7 + $0x60] sm:$0xff] %vm525_vm1, %v521_v57  ;;  %v497_v58 = vpop.xlane.xlu1 %496 }
 0x266   :  { %v522_v59 = vadd.f32 %v565_v32, %v497_v58  ;;  %v499_v60 = vpop.xlane.xlu0 %498 }
 0x267   :  { %v523_v61 = vadd.f32 %v565_v32, %v499_v60 }
 0x268   :  { %539 = vst.msk [vmem:[%s1029_s7 + $0x68] sm:$0xff] %vm525_vm1, %v522_v59 }
 0x269   :  { %540 = vst.msk [vmem:[%s1029_s7 + $0x70] sm:$0xff] %vm525_vm1, %v523_v61  ;;  %v501_v62 = vpop.xlane.xlu1 %500 }
 0x26a   :  { %v524_v63 = vadd.f32 %v565_v32, %v501_v62 }
 0x26c   :  { %541 = vst.msk [vmem:[%s1029_s7 + $0x78] sm:$0xff] %vm525_vm1, %v524_v63 }

</bundles_post_ra>
